<compile_context>
chip_gen: v5e
topology: v5e:2x2
jax: 0.10.0
libtpu: 0.0.40
codegen_flags: <defaults>
</compile_context>

<pallas_src>
import functools

import jax
import jax.numpy as jnp
from jax.experimental import pallas as pl
from jax.experimental.pallas import tpu as pltpu


def _round_up(v: int, m: int) -> int:
    return ((v + m - 1) // m) * m


def _vmem_block_bytes(rows: int, cols: int) -> int:
    # Conservative VMEM footprint of one block: lane/sublane padded, 4 B/elem.
    return _round_up(max(rows, 1), 8) * _round_up(max(cols, 1), 128) * 4


def _fused_mlp_kernel(*refs, num_layers: int):
    """Whole MLP in one kernel body.

    refs = (x_ref, w0_ref, b0_ref, w1_ref, b1_ref, ..., o_ref)
    x = x @ w0 + b0; then for each later layer: x = relu(x) @ w_i + b_i.
    Matmuls run on the MXU with f32 accumulation; relu / bias add are f32.
    """
    x_ref = refs[0]
    o_ref = refs[-1]
    wb = refs[1:-1]

    op_dtype = x_ref.dtype  # bf16 (default fast path) or f32 (exact path)
    x = x_ref[...]
    for i in range(num_layers):
        if i > 0:
            # act applied exactly once per hidden layer (f32 on the VPU), then
            # cast back to the MXU operand dtype.
            x = jnp.maximum(x, 0.0).astype(op_dtype)
        w = wb[2 * i][...]
        b = wb[2 * i + 1][...]  # [1, C_out] -> broadcasts over rows
        x = jnp.dot(x, w, preferred_element_type=jnp.float32) + b.astype(jnp.float32)
    o_ref[...] = x.astype(o_ref.dtype)
    # dropout (p=0.0) is identity; the module's BatchNorm layers are never used
    # in forward(), so none are applied here.


def mlp_forward(x, params, *, block_rows: int = 512, use_bf16: bool = True):
    """Fused MLP forward: one pallas_call for all layers.

    x:      [N, C_in] f32
    params: list of (w [C_in, C_out], b [1, C_out]) f32 pairs
    """
    n, c_in = x.shape
    num_layers = len(params)
    chans = [c_in] + [w.shape[1] for (w, _) in params]
    c_out = chans[-1]
    op_dtype = jnp.bfloat16 if use_bf16 else jnp.float32
    op_bytes = 2 if use_bf16 else 4
    row_align = 16 if use_bf16 else 8  # bf16 sublane tile is (16, 128)

    # ---- Row-tiling plan ---------------------------------------------------
    n_sub = _round_up(n, row_align)

    def plan(rows_cap):
        num_tiles = pl.cdiv(n_sub, rows_cap)
        # v7x has 2 TensorCores per chip: use >= 2 parallel row tiles whenever
        # there are enough real rows for it to matter.
        if n >= 16 and num_tiles < 2:
            num_tiles = 2
        tile_rows = _round_up(pl.cdiv(n_sub, num_tiles), row_align)
        return tile_rows, num_tiles

    def vmem_estimate(tile_rows):
        est = 2 * _vmem_block_bytes(tile_rows, c_in)          # x (double-buffered)
        est += 2 * _vmem_block_bytes(tile_rows, c_out)        # out (double-buffered)
        for (w, _), co in zip(params, chans[1:]):
            est += _vmem_block_bytes(w.shape[0], co)          # weight (Buffered(1))
            est += _vmem_block_bytes(1, co)                   # bias   (Buffered(1))
        est += 2 * _vmem_block_bytes(tile_rows, max(chans))   # live intermediates
        return est

    tile_rows, num_tiles = plan(block_rows)
    budget = 48 << 20  # stay well under v7x's 64 MiB physical VMEM
    while vmem_estimate(tile_rows) > budget and block_rows > 256:
        block_rows = max(256, block_rows // 2)  # shrink rows, never lane width
        tile_rows, num_tiles = plan(block_rows)
    # TODO(synk): if the weights alone exceed the VMEM budget (very large hidden
    # widths), split the contraction with a K grid axis + accumulator scratch,
    # or fall back to per-layer pallas_calls; not needed at these widths.

    n_pad = tile_rows * num_tiles

    # ---- HBM-side operands at native channel widths (no 128-lane padding) ---
    x_p = x if n_pad == n else jnp.pad(x, ((0, n_pad - n), (0, 0)))
    x_p = x_p.astype(op_dtype)

    flat_args = [x_p]
    in_specs = [pl.BlockSpec((tile_rows, c_in), lambda i: (i, 0))]
    for (w, b) in params:
        flat_args.append(w.astype(op_dtype))
        flat_args.append(b.reshape(1, -1).astype(op_dtype))
        # Full-extent, grid-invariant blocks stay VMEM-resident across row
        # tiles; single-buffered since the block never changes.
        in_specs.append(pl.BlockSpec(tuple(w.shape), lambda i: (0, 0),
                                     pipeline_mode=pl.Buffered(1)))
        in_specs.append(pl.BlockSpec((1, w.shape[1]), lambda i: (0, 0),
                                     pipeline_mode=pl.Buffered(1)))

    out_spec = pl.BlockSpec((tile_rows, c_out), lambda i: (i, 0))

    flops = 2 * n_pad * sum(ci * co for ci, co in zip(chans[:-1], chans[1:]))
    bytes_accessed = (n_pad * c_in * op_bytes
                      + sum((w.size + co) * op_bytes
                            for (w, _), co in zip(params, chans[1:]))
                      + n_pad * c_out * 4)
    vmem_limit = min(max(int(1.5 * vmem_estimate(tile_rows)) + (4 << 20), 32 << 20),
                     64 << 20)

    kernel = functools.partial(_fused_mlp_kernel, num_layers=num_layers)
    out_p = pl.pallas_call(
        kernel,
        out_shape=jax.ShapeDtypeStruct((n_pad, c_out), jnp.float32),
        grid=(num_tiles,),
        in_specs=in_specs,
        out_specs=out_spec,
        compiler_params=pltpu.CompilerParams(
            dimension_semantics=("parallel",),   # shard row tiles across TCs
            vmem_limit_bytes=vmem_limit,
        ),
        cost_estimate=pl.CostEstimate(flops=flops, transcendentals=0,
                                      bytes_accessed=bytes_accessed),
    )(*flat_args)

    # Padded rows (bias-valued) are sliced away; never consume out_p directly.
    return out_p if n_pad == n else out_p[:n]


def init_params(key, channel_list):
    """Deterministic param init matching the Linear shapes in the module."""
    params = []
    for c_in, c_out in zip(channel_list[:-1], channel_list[1:]):
        key, kw, kb = jax.random.split(key, 3)
        bound = 1.0 / jnp.sqrt(jnp.float32(c_in))
        w = jax.random.uniform(kw, (c_in, c_out), jnp.float32, -bound, bound)
        b = jax.random.uniform(kb, (1, c_out), jnp.float32, -bound, bound)
        params.append((w, b))
    return params


def mlp_ref(x, params):
    """Pure-JAX f32 reference for correctness checking."""
    (w0, b0), *rest = params
    x = x @ w0 + b0
    for (w, b) in rest:
        x = jnp.maximum(x, 0.0) @ w + b
    return x


if __name__ == "__main__":
    # MLP(in_channels=16, hidden_channels=32, out_channels=8, num_layers=3)
    # -> channel_list = [16, 32, 32, 8]
    channel_list = [16, 32, 32, 8]
    n = 8  # number of samples ([N, C] input)

    key = jax.random.PRNGKey(0)
    kx, kp = jax.random.split(key)
    x = jax.random.normal(kx, (n, channel_list[0]), jnp.float32)
    params = init_params(kp, channel_list)
    ref = mlp_ref(x, params)

    # Exact path (f32 MXU operands): tight tolerance against the f32 reference.
    fwd_f32 = jax.jit(functools.partial(mlp_forward, use_bf16=False))
    out_f32 = jax.block_until_ready(fwd_f32(x, params))
    assert out_f32.shape == (n, channel_list[-1]), out_f32.shape
    assert jnp.allclose(out_f32, ref, atol=1e-5, rtol=1e-5), (
        float(jnp.max(jnp.abs(out_f32 - ref))))

    # Default fast path (bf16 MXU operands, f32 accumulate + f32 epilogue):
    # relaxed tolerance to account for bf16 operand rounding.
    fwd = jax.jit(mlp_forward)
    out = jax.block_until_ready(fwd(x, params))
    assert out.shape == (n, channel_list[-1]), out.shape
    assert jnp.allclose(out, ref, atol=5e-2, rtol=5e-2), (
        float(jnp.max(jnp.abs(out - ref))))

    print("KERNEL_OK")
</pallas_src>

<mosaic_0001>
module attributes {stable_mosaic.version = 11 : i64} {
  func.func @_fused_mlp_kernel(%arg0: i32, %arg1: memref<8x16xf32, #tpu.memory_space<vmem>>, %arg2: memref<16x32xf32, #tpu.memory_space<vmem>>, %arg3: memref<1x32xf32, #tpu.memory_space<vmem>>, %arg4: memref<32x32xf32, #tpu.memory_space<vmem>>, %arg5: memref<1x32xf32, #tpu.memory_space<vmem>>, %arg6: memref<32x8xf32, #tpu.memory_space<vmem>>, %arg7: memref<1x8xf32, #tpu.memory_space<vmem>>, %arg8: memref<8x8xf32, #tpu.memory_space<vmem>>) attributes {dimension_semantics = [#tpu.dimension_semantics<parallel>], iteration_bounds = array<i64: 1>, scalar_prefetch = 0 : i64, scratch_operands = 0 : i64, tpu.core_type = #tpu.core_type<tc>, window_params = [{transform_indices = @transform_0, window_bounds = array<i64: 8, 16>}, {pipeline_mode = #tpu.pipeline_mode<synchronous>, transform_indices = @transform_1, window_bounds = array<i64: 16, 32>}, {pipeline_mode = #tpu.pipeline_mode<synchronous>, transform_indices = @transform_2, window_bounds = array<i64: 1, 32>}, {pipeline_mode = #tpu.pipeline_mode<synchronous>, transform_indices = @transform_3, window_bounds = array<i64: 32, 32>}, {pipeline_mode = #tpu.pipeline_mode<synchronous>, transform_indices = @transform_4, window_bounds = array<i64: 1, 32>}, {pipeline_mode = #tpu.pipeline_mode<synchronous>, transform_indices = @transform_5, window_bounds = array<i64: 32, 8>}, {pipeline_mode = #tpu.pipeline_mode<synchronous>, transform_indices = @transform_6, window_bounds = array<i64: 1, 8>}, {transform_indices = @transform_7, window_bounds = array<i64: 8, 8>}]} {
    %c0 = arith.constant 0 : index
    %c0_0 = arith.constant 0 : index
    %0 = vector.load %arg1[%c0, %c0_0] : memref<8x16xf32, #tpu.memory_space<vmem>>, vector<8x16xf32>
    %c0_1 = arith.constant 0 : index
    %c0_2 = arith.constant 0 : index
    %1 = vector.load %arg2[%c0_1, %c0_2] : memref<16x32xf32, #tpu.memory_space<vmem>>, vector<16x32xf32>
    %c0_3 = arith.constant 0 : index
    %c0_4 = arith.constant 0 : index
    %2 = vector.load %arg3[%c0_3, %c0_4] : memref<1x32xf32, #tpu.memory_space<vmem>>, vector<1x32xf32>
    %cst = arith.constant dense<0.000000e+00> : vector<8x32xf32>
    %3 = tpu.matmul %0, %1, %cst {dimension_numbers = #tpu.dot_dimension_numbers<[1], [0], [0], [1], [0, 0, 1, 1], [], []>} : vector<8x16xf32>, vector<16x32xf32>, vector<8x32xf32> -> vector<8x32xf32>
    %4 = vector.broadcast %2 : vector<1x32xf32> to vector<8x32xf32>
    %5 = arith.addf %3, %4 : vector<8x32xf32>
    %cst_5 = arith.constant 0.000000e+00 : f32
    %6 = vector.broadcast %cst_5 : f32 to vector<8x32xf32>
    %7 = arith.maximumf %5, %6 : vector<8x32xf32>
    %c0_6 = arith.constant 0 : index
    %c0_7 = arith.constant 0 : index
    %8 = vector.load %arg4[%c0_6, %c0_7] : memref<32x32xf32, #tpu.memory_space<vmem>>, vector<32x32xf32>
    %c0_8 = arith.constant 0 : index
    %c0_9 = arith.constant 0 : index
    %9 = vector.load %arg5[%c0_8, %c0_9] : memref<1x32xf32, #tpu.memory_space<vmem>>, vector<1x32xf32>
    %cst_10 = arith.constant dense<0.000000e+00> : vector<8x32xf32>
    %10 = tpu.matmul %7, %8, %cst_10 {dimension_numbers = #tpu.dot_dimension_numbers<[1], [0], [0], [1], [0, 0, 1, 1], [], []>} : vector<8x32xf32>, vector<32x32xf32>, vector<8x32xf32> -> vector<8x32xf32>
    %11 = vector.broadcast %9 : vector<1x32xf32> to vector<8x32xf32>
    %12 = arith.addf %10, %11 : vector<8x32xf32>
    %cst_11 = arith.constant 0.000000e+00 : f32
    %13 = vector.broadcast %cst_11 : f32 to vector<8x32xf32>
    %14 = arith.maximumf %12, %13 : vector<8x32xf32>
    %c0_12 = arith.constant 0 : index
    %c0_13 = arith.constant 0 : index
    %15 = vector.load %arg6[%c0_12, %c0_13] : memref<32x8xf32, #tpu.memory_space<vmem>>, vector<32x8xf32>
    %c0_14 = arith.constant 0 : index
    %c0_15 = arith.constant 0 : index
    %16 = vector.load %arg7[%c0_14, %c0_15] : memref<1x8xf32, #tpu.memory_space<vmem>>, vector<1x8xf32>
    %cst_16 = arith.constant dense<0.000000e+00> : vector<8x8xf32>
    %17 = tpu.matmul %14, %15, %cst_16 {dimension_numbers = #tpu.dot_dimension_numbers<[1], [0], [0], [1], [0, 0, 1, 1], [], []>} : vector<8x32xf32>, vector<32x8xf32>, vector<8x8xf32> -> vector<8x8xf32>
    %18 = vector.broadcast %16 : vector<1x8xf32> to vector<8x8xf32>
    %19 = arith.addf %17, %18 : vector<8x8xf32>
    %c0_17 = arith.constant 0 : index
    %c0_18 = arith.constant 0 : index
    %20 = vector.load %arg8[%c0_17, %c0_18] : memref<8x8xf32, #tpu.memory_space<vmem>>, vector<8x8xf32>
    tpu.vector_store %arg8[%c0_17, %c0_18], %19 {strides = array<i32>} : memref<8x8xf32, #tpu.memory_space<vmem>>, vector<8x8xf32>,
    return
  }
  func.func @transform_0(%arg0: i32) -> (i32, i32) {
    %c0_i32 = arith.constant 0 : i32
    %c0_i32_0 = arith.constant 0 : i32
    return %arg0, %c0_i32 : i32, i32
  }
  func.func @transform_1(%arg0: i32) -> (i32, i32) {
    %c0_i32 = arith.constant 0 : i32
    %c0_i32_0 = arith.constant 0 : i32
    %c0_i32_1 = arith.constant 0 : i32
    return %c0_i32, %c0_i32_0 : i32, i32
  }
  func.func @transform_2(%arg0: i32) -> (i32, i32) {
    %c0_i32 = arith.constant 0 : i32
    %c0_i32_0 = arith.constant 0 : i32
    %c0_i32_1 = arith.constant 0 : i32
    return %c0_i32, %c0_i32_0 : i32, i32
  }
  func.func @transform_3(%arg0: i32) -> (i32, i32) {
    %c0_i32 = arith.constant 0 : i32
    %c0_i32_0 = arith.constant 0 : i32
    %c0_i32_1 = arith.constant 0 : i32
    return %c0_i32, %c0_i32_0 : i32, i32
  }
  func.func @transform_4(%arg0: i32) -> (i32, i32) {
    %c0_i32 = arith.constant 0 : i32
    %c0_i32_0 = arith.constant 0 : i32
    %c0_i32_1 = arith.constant 0 : i32
    return %c0_i32, %c0_i32_0 : i32, i32
  }
  func.func @transform_5(%arg0: i32) -> (i32, i32) {
    %c0_i32 = arith.constant 0 : i32
    %c0_i32_0 = arith.constant 0 : i32
    %c0_i32_1 = arith.constant 0 : i32
    return %c0_i32, %c0_i32_0 : i32, i32
  }
  func.func @transform_6(%arg0: i32) -> (i32, i32) {
    %c0_i32 = arith.constant 0 : i32
    %c0_i32_0 = arith.constant 0 : i32
    %c0_i32_1 = arith.constant 0 : i32
    return %c0_i32, %c0_i32_0 : i32, i32
  }
  func.func @transform_7(%arg0: i32) -> (i32, i32) {
    %c0_i32 = arith.constant 0 : i32
    %c0_i32_0 = arith.constant 0 : i32
    return %arg0, %c0_i32 : i32, i32
  }
}

</mosaic_0001>

<bundles_post_ra>
// kernel: mlp_forward.1
= control target key start
LH: loop header
LB: loop body
LE: loop exit
PB: predicated region body
PF: predicated region fallthrough
CT: control target
= control target key end

     0   :  { %12 = vsyncpa [#allocation3], 0  ;;  %s306_s0 = inlined_call_operand.vmem [shape: f32[8,16], index: 0, kind: input, shape index: {}]   ;;  %s307_s1 = inlined_call_operand.hbm [shape: f32[16,32], index: 1, kind: input, shape index: {}]   ;;  %s308_s2 = inlined_call_operand.vmem [shape: f32[1,32], index: 2, kind: input, shape index: {}]   ;;  %s309_s3 = inlined_call_operand.vmem [shape: f32[32,32], index: 3, kind: input, shape index: {}]   ;;  %s310_s4 = inlined_call_operand.vmem [shape: f32[1,32], index: 4, kind: input, shape index: {}]   ;;  %s311_s5 = inlined_call_operand.vmem [shape: f32[32,8], index: 5, kind: input, shape index: {}]   ;;  %s312_s6 = inlined_call_operand.vmem [shape: f32[1,8], index: 6, kind: input, shape index: {}]   ;;  %s313_s7 = inlined_call_operand.hbm [shape: f32[8,8], index: 7, kind: output, shape index: {}]  }
   0x1   :  { %13 = vsyncpa [#allocation4], 0  ;;  %s20_s26 = sshll.u32 %s307_s1, 4  ;;  %s220_s27 = smov [#allocation2]   ;;  %s21_s26 = int_to_ptr.hbm [resolvable:$true] %s20_s26 }
   0x2   :  { %s22_s28 = sshll.u32 %s220_s27, 4  ;;  %s221_s29 = smov 128   ;;  %s23_s28 = int_to_ptr.vmem [resolvable:$true] %s22_s28 }
   0x3   :  { %s222_s30 = smov 8  }
   0x4   :  { %28 = dma.hbm_to_vmem [thread:$0]  %s21_s26, 256, %s23_s28, [#allocation3], %s221_s29, %s221_s29, %s222_s30  }
   0x5   :  { %216 = dma.done.wait [#allocation3], 256  }
   0x6   :  { %217 = vsyncadd [#allocation3], 4294967040  ;;  %v45_v0 = vld [vmem:[#allocation2 + $0x8] sm:$0xff]  ;;  %v44_v1 = vld [vmem:[#allocation2] sm:$0xff]  ;;  %vm50_vm0 = vcmask 130048   ;;  %vm83_vm1 = vcmask 261120  }
   0x7   :  { %68 = vmatpush.msra.mxu0 %v45_v0  ;;  %v43_v2 = vld [vmem:[%s306_s0] sm:$0xff]  ;;  %v78_v3 = vld [vmem:[%s309_s3 + $0x18] sm:$0xff]  ;;  %v77_v4 = vld [vmem:[%s309_s3 + $0x10] sm:$0xff]  ;;  %s223_s28 = smov [#allocation5]   ;;  %s148_s9 = sshll.u32 %s313_s7, 4  ;;  %vm139_vm2 = vcmask 64512   ;;  %s149_s9 = int_to_ptr.hbm [resolvable:$true] %s148_s9 }
   0x8   :  { %99 = vmatpush.msra.mxu1 %v78_v3  ;;  %v76_v5 = vld [vmem:[%s309_s3 + $0x8] sm:$0xff]  ;;  %v75_v6 = vld [vmem:[%s309_s3] sm:$0xff]  ;;  %v111_v7 = vld [vmem:[%s311_s5 + $0x18] sm:$0xff]  ;;  %s146_s29 = sshll.u32 %s223_s28, 4  ;;  %s147_s29 = int_to_ptr.vmem [resolvable:$true] %s146_s29 }
   0x9   :  { %69 = vmatpush.msra.mxu0 %v44_v1  ;;  %131 = vmatpush.msra.mxu2 %v111_v7  ;;  %v165_v8 = vld [vmem:[%s308_s2] ss:$0 sm:$0xff]  ;;  %v110_v12 = vld [vmem:[%s311_s5 + $0x10] sm:$0xff]  ;;  %v109_v13 = vld [vmem:[%s311_s5 + $0x8] sm:$0xff] }
   0xa   :  { %158 = vmatmul.msk.f32.vlgmr.msra.gmra.mxu0 %vm50_vm0, %v43_v2  ;;  %100 = vmatpush.msra.mxu1 %v77_v4  ;;  %v108_v14 = vld [vmem:[%s311_s5] sm:$0xff] }
   0xb   :  { %132 = vmatpush.msra.mxu2 %v110_v12  ;;  %v166_v15 = vld [vmem:[%s310_s4] ss:$0 sm:$0xff] }
   0xc   :  { %101 = vmatpush.msra.mxu1 %v76_v5  ;;  %v167_v19 = vld [vmem:[%s312_s6] ss:$0 sm:$0xff] }
   0xd   :  { %133 = vmatpush.msra.mxu2 %v109_v13 }
   0xe   :  { %102 = vmatpush.msra.mxu1 %v75_v6 }
   0xf   :  { %134 = vmatpush.msra.mxu2 %v108_v14 }
  0x87   :  { %v71_v9 = vpop.f32.mrf.mxu0 }
  0x88   :  { %v72_v10 = vadd.f32 %v165_v8, %v71_v9 }
  0x8a   :  { %v74_v11 = vmax.f32 %v72_v10, 0.0 }
  0x8c   :  { %159 = vmatmul.msk.f32.vlgmr.msra.gmra.mxu1 %vm83_vm1, %v74_v11 }
 0x109   :  { %v104_v16 = vpop.f32.mrf.mxu1 }
 0x10a   :  { %v105_v17 = vadd.f32 %v166_v15, %v104_v16 }
 0x10c   :  { %v107_v18 = vmax.f32 %v105_v17, 0.0 }
 0x10e   :  { %160 = vmatmul.msk.f32.vlgmr.msra.gmra.mxu2 %vm83_vm1, %v107_v18 }
 0x191   :  { %v136_v20 = vpop.f32.mrf.mxu2 }
 0x192   :  { %v137_v21 = vadd.f32 %v167_v19, %v136_v20 }
 0x194   :  { %140 = vst.msk [vmem:[#allocation5] sm:$0xff] %vm139_vm2, %v137_v21 }
 0x195   :  { %151 = dma.vmem_to_hbm [thread:$0]  %s147_s29, 128, %s149_s9, [#allocation4]  }
 0x196   :  { %218 = dma.done.wait [#allocation4], 128  }
 0x197   :  { %219 = vsyncadd [#allocation4], 4294967168 }
 0x198   :  { %156 = vsyncpa [#allocation3], 1 }
 0x199   :  { %157 = vsyncpa [#allocation4], 1 }

</bundles_post_ra>
